<compile_context>
chip_gen: v7x
topology: tpu7x:2x2x1
jax: 0.10.0
libtpu: 0.0.40
codegen_flags: <defaults>
</compile_context>

<pallas_src>
import functools

import jax
import jax.numpy as jnp
from jax import lax
from jax.experimental import pallas as pl
from jax.experimental.pallas import tpu as pltpu

KH = KW = 3  # 3x3 conv, stride 1, padding 1


def _conv_as_matmul_relu_kernel(p_ref, w_ref, o_ref):
    """One image per grid step; conv expressed as a single im2col matmul.

    p_ref: (1, K, HW)   im2col patches (+ trailing ones-row carrying the bias)
    w_ref: (Cout, K)    reshaped conv weight with bias appended as last column
    o_ref: (1, Cout, HW) channel-major (lane-dense) output, == out.view(C, H*W)
    """
    acc = jnp.dot(w_ref[...], p_ref[0], preferred_element_type=jnp.float32)
    o_ref[0] = jnp.maximum(acc, 0.0).astype(o_ref.dtype)  # bias already in matmul


@functools.partial(jax.jit, static_argnames=("permute",))
def cnn_forward(images_nchw, w_oihw, bias, *, permute="batch_first"):
    """Pallas implementation of CNN.forward (freeze=True / eval, dropout p=0)."""
    B, Cin, H, W = images_nchw.shape
    Cout = w_oihw.shape[0]
    HW = H * W
    K = Cin * KH * KW + 1  # +1 ones-row folds the bias into the matmul

    # --- im2col in the wrapper (single fused XLA producer, built directly from
    #     NCHW so no layout transpose is needed). K ordering is (cin, kh, kw),
    #     matching w_oihw.reshape(Cout, Cin*KH*KW).
    x_pad = jnp.pad(images_nchw, ((0, 0), (0, 0), (1, 1), (1, 1)))
    taps = [x_pad[:, :, kh:kh + H, kw:kw + W]
            for kh in range(KH) for kw in range(KW)]
    patches = jnp.stack(taps, axis=2).reshape(B, Cin * KH * KW, HW)
    patches = jnp.concatenate(
        [patches, jnp.ones((B, 1, HW), patches.dtype)], axis=1)        # (B, K, HW)
    w_aug = jnp.concatenate(
        [w_oihw.reshape(Cout, Cin * KH * KW), bias[:, None]], axis=1)  # (Cout, K)

    out_cm = pl.pallas_call(
        _conv_as_matmul_relu_kernel,
        out_shape=jax.ShapeDtypeStruct((B, Cout, HW), jnp.float32),
        grid_spec=pltpu.PrefetchScalarGridSpec(
            num_scalar_prefetch=0,
            grid=(B,),
            in_specs=[
                pl.BlockSpec((1, K, HW), lambda b: (b, 0, 0)),
                pl.BlockSpec((Cout, K), lambda b: (0, 0)),  # resident weights+bias
            ],
            out_specs=pl.BlockSpec((1, Cout, HW), lambda b: (b, 0, 0)),
        ),
        compiler_params=pltpu.CompilerParams(
            dimension_semantics=("parallel",)),
    )(patches, w_aug)

    # dropout_out: p=0.0 and module is frozen (eval) -> identity.
    # out_cm is exactly PyTorch's out.view(B, C, H*W).

    if permute == "no_permute":
        return out_cm.reshape(B, Cout, H, W)
    elif permute == "batch_first":
        out = jnp.transpose(out_cm, (0, 2, 1))            # (B, H*W, C)
        if out.shape[1] == 1:
            out = out[:, 0, :]
        return out
    elif permute == "spatial_first":
        return jnp.transpose(out_cm, (2, 0, 1))           # (H*W, B, C)
    else:
        raise NotImplementedError(permute)


def _reference(images_nchw, w_oihw, bias, permute="batch_first"):
    """Pure-JAX reference mirroring the PyTorch ops."""
    out = lax.conv_general_dilated(
        images_nchw, w_oihw, window_strides=(1, 1), padding=((1, 1), (1, 1)),
        dimension_numbers=("NCHW", "OIHW", "NCHW"))
    out = jnp.maximum(out + bias[None, :, None, None], 0.0)
    B, C = out.shape[:2]
    flat = out.reshape(B, C, -1)
    if permute == "batch_first":
        r = jnp.transpose(flat, (0, 2, 1))
        if r.shape[1] == 1:
            r = r[:, 0, :]
        return r
    elif permute == "spatial_first":
        return jnp.transpose(flat, (2, 0, 1))
    return out


if __name__ == "__main__":
    # Small shapes consistent with the module: images (B, Cin, H, W)
    B, Cin, H, W = 2, 4, 16, 16
    Cout = 32

    key = jax.random.PRNGKey(0)
    k_x, k_w, k_b = jax.random.split(key, 3)
    images = jax.random.normal(k_x, (B, Cin, H, W), dtype=jnp.float32)
    # Deterministic synthetic backbone parameters (PyTorch OIHW layout).
    w_oihw = 0.1 * jax.random.normal(k_w, (Cout, Cin, KH, KW), dtype=jnp.float32)
    bias = 0.05 * jax.random.normal(k_b, (Cout,), dtype=jnp.float32)

    out = cnn_forward(images, w_oihw, bias, permute="batch_first")
    out = jax.block_until_ready(out)

    assert out.shape == (B, H * W, Cout), out.shape

    ref = _reference(images, w_oihw, bias, permute="batch_first")
    assert jnp.allclose(out, ref, atol=1e-4, rtol=1e-4), "mismatch vs reference"

    print("KERNEL_OK")
</pallas_src>

<mosaic_0001>
module attributes {stable_mosaic.version = 11 : i64} {
  func.func @_conv_as_matmul_relu_kernel(%arg0: i32, %arg1: memref<1x37x256xf32, #tpu.memory_space<vmem>>, %arg2: memref<32x37xf32, #tpu.memory_space<vmem>>, %arg3: memref<1x32x256xf32, #tpu.memory_space<vmem>>) attributes {dimension_semantics = [#tpu.dimension_semantics<parallel>], iteration_bounds = array<i64: 2>, scalar_prefetch = 0 : i64, scratch_operands = 0 : i64, tpu.core_type = #tpu.core_type<tc>, window_params = [{transform_indices = @transform_0, window_bounds = array<i64: 1, 37, 256>}, {pipeline_mode = #tpu.pipeline_mode<synchronous>, transform_indices = @transform_1, window_bounds = array<i64: 32, 37>}, {transform_indices = @transform_2, window_bounds = array<i64: 1, 32, 256>}]} {
    %c0 = arith.constant 0 : index
    %c0_0 = arith.constant 0 : index
    %0 = vector.load %arg2[%c0, %c0_0] : memref<32x37xf32, #tpu.memory_space<vmem>>, vector<32x37xf32>
    %c0_1 = arith.constant 0 : index
    %c0_2 = arith.constant 0 : index
    %c0_3 = arith.constant 0 : index
    %1 = vector.load %arg1[%c0_1, %c0_2, %c0_3] : memref<1x37x256xf32, #tpu.memory_space<vmem>>, vector<1x37x256xf32>
    %2 = vector.shape_cast %1 : vector<1x37x256xf32> to vector<37x256xf32>
    %cst = arith.constant dense<0.000000e+00> : vector<32x256xf32>
    %3 = tpu.matmul %0, %2, %cst {dimension_numbers = #tpu.dot_dimension_numbers<[1], [0], [0], [1], [0, 0, 1, 1], [], []>} : vector<32x37xf32>, vector<37x256xf32>, vector<32x256xf32> -> vector<32x256xf32>
    %cst_4 = arith.constant 0.000000e+00 : f32
    %4 = vector.broadcast %cst_4 : f32 to vector<32x256xf32>
    %5 = arith.maximumf %3, %4 : vector<32x256xf32>
    %c0_5 = arith.constant 0 : index
    %c0_6 = arith.constant 0 : index
    %c0_7 = arith.constant 0 : index
    %6 = vector.load %arg3[%c0_5, %c0_6, %c0_7] : memref<1x32x256xf32, #tpu.memory_space<vmem>>, vector<1x32x256xf32>
    %7 = vector.shape_cast %6 : vector<1x32x256xf32> to vector<32x256xf32>
    %8 = vector.shape_cast %5 : vector<32x256xf32> to vector<1x32x256xf32>
    tpu.vector_store %arg3[%c0_5, %c0_6, %c0_7], %8 {strides = array<i32>} : memref<1x32x256xf32, #tpu.memory_space<vmem>>, vector<1x32x256xf32>,
    return
  }
  func.func @transform_0(%arg0: i32) -> (i32, i32, i32) {
    %c0_i32 = arith.constant 0 : i32
    %c0_i32_0 = arith.constant 0 : i32
    %c0_i32_1 = arith.constant 0 : i32
    return %arg0, %c0_i32, %c0_i32_0 : i32, i32, i32
  }
  func.func @transform_1(%arg0: i32) -> (i32, i32) {
    %c0_i32 = arith.constant 0 : i32
    %c0_i32_0 = arith.constant 0 : i32
    %c0_i32_1 = arith.constant 0 : i32
    return %c0_i32, %c0_i32_0 : i32, i32
  }
  func.func @transform_2(%arg0: i32) -> (i32, i32, i32) {
    %c0_i32 = arith.constant 0 : i32
    %c0_i32_0 = arith.constant 0 : i32
    %c0_i32_1 = arith.constant 0 : i32
    return %arg0, %c0_i32, %c0_i32_0 : i32, i32, i32
  }
}

</mosaic_0001>

<bundles_post_ra>
// kernel: cnn_forward.1
= control target key start
LH: loop header
LB: loop body
LE: loop exit
PB: predicated region body
PF: predicated region fallthrough
CT: control target
= control target key end

     0   :  { %7 = vsyncpa [#allocation3], 0  ;;  %s634_s0 = inlined_call_operand.vmem [shape: f32[2,37,256], index: 0, kind: input, shape index: {}]   ;;  %s635_s1 = inlined_call_operand.vmem [shape: f32[32,37], index: 1, kind: input, shape index: {}]   ;;  %s636_s2 = inlined_call_operand.hbm [shape: f32[2,32,256], index: 2, kind: output, shape index: {}]  }
   0x1   :  { %9 = vsyncpa [#allocation3 + $0x1], 0  ;;  %s515_s9 = smov 0   ;;  %s517_s10 = smov 0  }
   0x2   :  { %s519_s11 = smov 0   ;;  %s521_s12 = smov 0  }
   0x3 LB: > { %s536_s13 = sadd.s32 4294967295, %s494_s12   ;;  %s357_s14 = sadd.s32 4294967294, %s494_s12   ;;  %s494_s12 = sphi %s521_s12, %s642_s12   ;;  %s490_s11 = sphi %s519_s11, %s641_s11   ;;  %s486_s10 = sphi %s517_s10, %s640_s10   ;;  %s482_s9 = sphi %s515_s9, %s639_s9  }
   0x4   : > { %s540_s15 = sadd.s32 1, %s494_s12   ;;  %s69_s16 = sadd.s32 1, %s490_s11 }
   0x5   : > { %s66_s17 = ssub.s32 %s494_s12, %s540_s15  ;;  %p79_p0 = scmp.ne.s32.totalorder %s490_s11, %s486_s10 }
   0x6   : > { %p67_p1 = scmp.eq.s32.totalorder %s66_s17, 0  ;;  %p80_p2 = scmp.eq.s32.totalorder %s536_s13, 1 }
   0x7   : > { %p85_p3 = scmp.ne.s32.totalorder %s486_s10, %s482_s9  ;;  %p86_p4 = scmp.eq.s32.totalorder %s357_s14, 1 }
   0x8   : > { %s551_s18 = scalar_select %p67_p1, %s490_s11, %s69_s16  }
   0x9   : > { %p553_p5 = por %p80_p2, %p79_p0  ;;  %p557_p6 = por %p86_p4, %p85_p3 }
   0xa   : > { %p360_p7 = scmp.ge.s32.totalorder %s494_s12, 1  ;;  %p115_p8 = scmp.lt.s32.totalorder %s494_s12, 3 }
   0xc   : > { %p116_p9 = pnand %p360_p7, %p115_p8 }
   0xd   : > { %p137_p10 = scmp.lt.s32.totalorder (!%p116_p9), %s536_s13, 1  ;;  %v496_v0 = vmov (!%p116_p9), 0.0   ;;  %vm169_vm0 = vcmask (!%p116_p9), 1044480   ;;  %v142_v15 = vld [vmem:[%s635_s1] sm:$0xff] (!%p116_p9)  ;;  %vm156_vm1 = vcmask (!%p116_p9), 302080   ;;  %v144_v16 = vld [vmem:[%s635_s1 + $0x10] sm:$0xff] (!%p116_p9) }
   0xe   : > { %119 = sbr.rel (%p116_p9) target bundleno = 273 (0x111), region = 28  ;;  %240 = vmatprep.mubr.f32.mxu0 (!%p116_p9), %v496_v0  ;;  %252 = vmatprep.mubr.f32.mxu1 (!%p116_p9), %v496_v0  ;;  %v143_v17 = vld [vmem:[%s635_s1 + $0x8] sm:$0xff] (!%p116_p9)  ;;  %v145_v18 = vld [vmem:[%s635_s1 + $0x18] sm:$0xff] (!%p116_p9)  ;;  %s134_s6 = sand.u32 (!%p116_p9), 1, %s486_s10  }
   0xf   : > { %s361_s7 = sshll.u32 (!%p116_p9), %s134_s6, 6  ;;  %s374_s8 = sshll.u32 (!%p116_p9), %s536_s13, 10 }
  0x10   : > { %s136_s14 = scalar_lea.vmem (!%p116_p9), [#allocation2], %s361_s7  ;;  %s497_s24 = smov (!%p116_p9), [#allocation2]  }
  0x11   : > { %s295_s16 = sshll.u32 (!%p116_p9), %s136_s14, 4  ;;  %s589_s16 = int_to_ptr.vmem [resolvable:$true] %s295_s16 }
  0x12   : > { %s432_s23 = scalar_lea.vmem (!%p116_p9), %s589_s16, 1024 }
  0x13   : > { %p433_p11 = scmp.ne.s32.totalorder (!%p116_p9), %s589_s16, %s432_s23 }
  0x15   : > { %s138_s21 = scalar_select %p137_p10, %s536_s13, 1 }
  0x16   : > { %s593_s13 = scalar_lea.sflag [#allocation3], %s134_s6  ;;  %p434_p12 = pnand %p433_p11, %p553_p5 }
  0x17   : > { %s389_s22 = smul.u32 80, %s138_s21 }
  0x18   : > { %p435_p13 = pneg %p434_p12 }
  0x19   : > { %s141_s25 = scalar_lea.vmem %s634_s0, %s389_s22  ;;  %s587_s22 = scalar_lea.hbm %s636_s2, %s374_s8 }
  0x1a   : > { %v147_v1 = vld [vmem:[%s141_s25 + $0x8] sm:$0xff]  ;;  %v149_v2 = vld [vmem:[%s141_s25 + $0x18] sm:$0xff]  ;;  %v146_v3 = vld [vmem:[%s141_s25] sm:$0xff] }
  0x1b   : > { %v375_v4 = vpack.c.bf16 %v149_v2, %v147_v1  ;;  %v148_v5 = vld [vmem:[%s141_s25 + $0x10] sm:$0xff]  ;;  %v151_v6 = vld [vmem:[%s141_s25 + $0x28] sm:$0xff]  ;;  %v153_v7 = vld [vmem:[%s141_s25 + $0x38] sm:$0xff] }
  0x1c   : > { %v377_v8 = vpack.c.bf16 %v148_v5, %v146_v3  ;;  %v379_v9 = vpack.c.bf16 %v153_v7, %v151_v6  ;;  %v150_v10 = vld [vmem:[%s141_s25 + $0x20] sm:$0xff]  ;;  %v152_v11 = vld [vmem:[%s141_s25 + $0x30] sm:$0xff]  ;;  %v155_v13 = vld [vmem:[%s141_s25 + $0x48] sm:$0x1f] }
  0x1d   : > { %376 = vmatprep.subr.bf16.mxu0 %v375_v4  ;;  %383 = vmatprep.subr.bf16.mxu1 %v375_v4  ;;  %v381_v12 = vpack.c.bf16 %v152_v11, %v150_v10  ;;  %v154_v14 = vld [vmem:[%s141_s25 + $0x40] sm:$0x1f]  ;;  %s436_s25 = sshll.u32 %s497_s24, 4  ;;  %s437_s25 = int_to_ptr.vmem [resolvable:$false] %s436_s25 }
  0x1e   : > { %378 = vmatpush1.bf16.msra.mxu0 %v377_v8  ;;  %386 = vmatpush1.bf16.msra.mxu1 %v377_v8  ;;  %s438_s26 = scalar_lea.vmem %s437_s25, 2048  ;;  %p439_p0 = scmp.lt.s32.totalorder %s589_s16, %s437_s25 }
  0x1f   : > { %380 = vmatprep.subr.bf16.mxu0 %v379_v9  ;;  %384 = vmatprep.subr.bf16.mxu1 %v379_v9  ;;  %p440_p1 = scmp.lt.s32.totalorder %s438_s26, %s432_s23 }
  0x21   : > { %p441_p2 = por %p440_p1, %p439_p0 }
  0x22   : > { %382 = vmatpush1.bf16.msra.mxu0 %v381_v12  ;;  %387 = vmatpush1.bf16.msra.mxu1 %v381_v12 }
  0x23   : > { %363 = vmatprep.subr.msk.mxu0 %vm169_vm0, %v155_v13  ;;  %385 = vmatprep.subr.msk.mxu1 %vm169_vm0, %v155_v13  ;;  %p442_p3 = pnand %p441_p2, %p435_p13 }
  0x26   : > { %364 = vmatpush1.msk.msra.mxu0 %vm169_vm0, %v154_v14  ;;  %388 = vmatpush1.msk.msra.mxu1 %vm169_vm0, %v154_v14 }
  0x27   : > { %365 = vmatmul.mubr.msk.f32.vlgmr.msra.gmra.mrb[0].mxu0 %vm156_vm1, %v142_v15  ;;  %367 = vmatmul.mubr.msk.f32.vlgmr.msra.gmra.mrb[0].mxu1 %vm156_vm1, %v144_v16 }
  0x28   : > { %246 = vmatprep.mubr.f32.mxu0 %v496_v0  ;;  %258 = vmatprep.mubr.f32.mxu1 %v496_v0 }
  0x2b   : > { %366 = vmatmul.mubr.msk.f32.gmra.mrb[2].mxu0 %vm156_vm1, %v143_v17  ;;  %368 = vmatmul.mubr.msk.f32.gmra.mrb[2].mxu1 %vm156_vm1, %v145_v18 }
  0xfa   : > { %v242_v19 = vpop.f32.mrb[0].mxu0  ;;  %v254_v20 = vpop.f32.mrb[0].mxu1 }
  0xfb   : > { %v265_v21 = vmax.f32 %v242_v19, 0.0  ;;  %v269_v22 = vmax.f32 %v254_v20, 0.0  ;;  %v244_v23 = vpop.f32.mrb[1].mxu0  ;;  %v256_v24 = vpop.f32.mrb[1].mxu1 }
  0xfc   : > { %v266_v25 = vmax.f32 %v244_v23, 0.0  ;;  %v270_v26 = vmax.f32 %v256_v24, 0.0 }
  0xfd   : > { %273 = vst [vmem:[%s136_s14] sm:$0xff] %v265_v21  ;;  %277 = vst [vmem:[%s136_s14 + $0x20] sm:$0xff] %v269_v22 }
  0xfe   : > { %274 = vst [vmem:[%s136_s14 + $0x8] sm:$0xff] %v266_v25  ;;  %278 = vst [vmem:[%s136_s14 + $0x28] sm:$0xff] %v270_v26  ;;  %v248_v27 = vpop.f32.mrb[2].mxu0  ;;  %v260_v28 = vpop.f32.mrb[2].mxu1 }
  0xff   : > { %v267_v29 = vmax.f32 %v248_v27, 0.0  ;;  %v271_v30 = vmax.f32 %v260_v28, 0.0  ;;  %v250_v31 = vpop.f32.mrb[3].mxu0  ;;  %v262_v32 = vpop.f32.mrb[3].mxu1 }
 0x100   : > { %v268_v33 = vmax.f32 %v250_v31, 0.0  ;;  %v272_v34 = vmax.f32 %v262_v32, 0.0 }
 0x101   : > { %275 = vst [vmem:[%s136_s14 + $0x10] sm:$0xff] %v267_v29  ;;  %279 = vst [vmem:[%s136_s14 + $0x30] sm:$0xff] %v271_v30 }
 0x102   : > { %276 = vst [vmem:[%s136_s14 + $0x18] sm:$0xff] %v268_v33  ;;  %280 = vst [vmem:[%s136_s14 + $0x38] sm:$0xff] %v272_v34 }
 0x103   : > { %445 = shalt.err (!%p442_p3)
}
 0x104   : > { %s446_s27 = scalar_lea.hbm %s587_s22, 1024  ;;  %s450_s30 = scalar_lea.hbm %s636_s2, 2048 }
 0x105   : > { %p447_p4 = scmp.ne.s32.totalorder %s587_s22, %s446_s27  ;;  %p451_p9 = scmp.lt.u32.totalorder %s587_s22, %s636_s2 }
 0x106   : > { %p452_p10 = scmp.lt.u32.totalorder %s450_s30, %s446_s27  ;;  %p454_p12 = scmp.lt.u32.totalorder %s446_s27, %s587_s22 }
 0x107   : > { %p448_p7 = pnand %p447_p4, %p553_p5 }
 0x108   : > { %p453_p11 = por %p452_p10, %p451_p9 }
 0x109   : > { %p449_p8 = pneg %p448_p7 }
 0x10a   : > { %p455_p13 = por %p454_p12, %p453_p11 }
 0x10c   : > { %p456_p0 = pnand %p455_p13, %p449_p8 }
 0x10e   : > { %459 = shalt.err (!%p456_p0)
}
 0x10f   : > { %s498_s5 = smov 256   ;;  %s499_s6 = smov 16  }
 0x110   : > { %390 = dma.vmem_to_hbm [thread:$0]  (%p553_p5), %s589_s16, 1024, %s587_s22, %s593_s13, %s498_s5, %s498_s5, %s499_s6  }
 0x111 PF: > { %p396_p1 = scmp.ge.s32.totalorder %s494_s12, 2  ;;  %s310_s7 = sand.u32 1, %s482_s9  }
 0x112   : > { %s311_s8 = scalar_lea.sflag [#allocation3], %s310_s7 }
 0x113   : > { %p393_p2 = pnand %p396_p1, %p557_p6 }
 0x115   : > { %477 = dma.done.wait (!%p393_p2), %s311_s8, 1024  }
 0x116   : > { %479 = vsyncadd (!%p393_p2), %s311_s8, 4294966272  ;;  %p12_p3 = scmp.ge.s32.totalorder %s540_s15, 4   ;;  %s639_s9 = smov %s486_s10 }
 0x117   : > { %s640_s10 = smov %s490_s11  ;;  %s641_s11 = smov %s551_s18 }
 0x118   : > { %s642_s12 = smov %s540_s15  ;;  %14 = sbr.rel (!%p12_p3) target bundleno = 3 (0x3), region = 63 }
 0x11f   :  { %316 = vsyncpa [#allocation3], 1 }
 0x120   :  { %318 = vsyncpa [#allocation3 + $0x1], 1 }

</bundles_post_ra>
